<compile_context>
chip_gen: v6e
topology: v6e:2x2x1
jax: 0.10.0
libtpu: 0.0.40
codegen_flags: <defaults>
</compile_context>

<pallas_src>
import functools

import jax
import jax.numpy as jnp
from jax.experimental import pallas as pl
from jax.experimental.pallas import tpu as pltpu


def _round_up(v, m):
    return ((v + m - 1) // m) * m


def _disc_kernel(x_ref, w1_ref, b1_ref, w2_ref, b2_ref, w3_ref, b3_ref, o_ref):
    # x_ref:  (TB, D)    compute dtype (bf16 or f32), pipelined per batch tile
    # w1_ref: (D, Hp)    compute dtype, VMEM-resident
    # b1_ref: (1, Hp)    f32
    # w2_ref: (Hp, Hp)   compute dtype, VMEM-resident
    # b2_ref: (1, Hp)    f32
    # w3_ref: (1, Hp)    f32   (fc3 weight as a row)
    # b3_ref: (1,)       f32   in SMEM (fc3 bias, scalar)
    # o_ref:  (TB, 1)    f32   (one logit per batch row)
    h1 = jnp.dot(x_ref[...], w1_ref[...], preferred_element_type=jnp.float32)
    h1 = jnp.maximum(h1 + b1_ref[...], 0.0)

    h2 = jnp.dot(h1.astype(w2_ref.dtype), w2_ref[...],
                 preferred_element_type=jnp.float32)
    h2 = jnp.maximum(h2 + b2_ref[...], 0.0)

    # fc3 with output width 1: VPU multiply + XLU lane reduction instead of a
    # 1-column MXU matmul.
    logit = jnp.sum(h2 * w3_ref[...], axis=-1, keepdims=True) + b3_ref[0]
    o_ref[...] = logit.astype(o_ref.dtype)


def prepare_params(params, *, compute_dtype=jnp.bfloat16):
    """Pad the hidden dim to a multiple of 128 and cast ONCE (hoisted out of
    the per-step forward).  Padding is mathematically inert: zero weights +
    zero bias -> zero (post-ReLU) hidden units -> zero fc3 contribution."""
    w1, b1, w2, b2, w3, b3 = params
    D, H = w1.shape
    Hp = _round_up(H, 128)
    w1p = jnp.pad(w1, ((0, 0), (0, Hp - H))).astype(compute_dtype)
    w2p = jnp.pad(w2, ((0, Hp - H), (0, Hp - H))).astype(compute_dtype)
    b1p = jnp.pad(b1.reshape(-1), (0, Hp - H)).reshape(1, Hp).astype(jnp.float32)
    b2p = jnp.pad(b2.reshape(-1), (0, Hp - H)).reshape(1, Hp).astype(jnp.float32)
    w3p = jnp.pad(w3.reshape(-1), (0, Hp - H)).reshape(1, Hp).astype(jnp.float32)
    b3p = b3.reshape(1).astype(jnp.float32)
    return (w1p, b1p, w2p, b2p, w3p, b3p)


@functools.partial(jax.jit, static_argnames=("batch_tile",))
def discriminator_forward(x_nchw, prepared_params, *, batch_tile=1024):
    """x_nchw: (B, C, H, W). prepared_params from prepare_params().
    Returns (B,) f32 logits (PyTorch .squeeze())."""
    w1p, b1p, w2p, b2p, w3p, b3p = prepared_params
    B = x_nchw.shape[0]
    D, Hp = w1p.shape
    compute_dtype = w1p.dtype

    # ---- batch tiling ----
    batch_tile = max(8, _round_up(int(batch_tile), 8))
    n_tiles = max(pl.cdiv(B, batch_tile), 2 if B >= 16 else 1)
    TB = _round_up(pl.cdiv(B, n_tiles), 8)
    n_tiles = pl.cdiv(B, TB)
    Bp = n_tiles * TB

    # ---- wrapper glue (fuses under jit): flatten, cast, pad batch rows only ----
    x = x_nchw.reshape(B, D).astype(compute_dtype)
    x = jnp.pad(x, ((0, Bp - B), (0, 0)))

    in_itemsize = jnp.dtype(compute_dtype).itemsize
    flops = 2.0 * Bp * (D * Hp + Hp * Hp + Hp)
    bytes_accessed = (Bp * D * in_itemsize         # x
                      + D * Hp * in_itemsize       # w1
                      + Hp * Hp * in_itemsize      # w2
                      + 3 * Hp * 4 + 4             # b1, b2, w3, b3
                      + Bp * 4)                    # out column

    # VMEM budget from actual tile sizes (double-buffer assumption) + headroom.
    vmem_need = 2 * (TB * _round_up(D, 128) * in_itemsize
                     + TB * 128 * 4
                     + _round_up(D, 8) * Hp * in_itemsize
                     + Hp * Hp * in_itemsize
                     + 3 * 8 * Hp * 4)
    vmem_limit = int(min(max(vmem_need + (4 << 20), 16 << 20), 64 << 20))

    out = pl.pallas_call(
        _disc_kernel,
        out_shape=jax.ShapeDtypeStruct((Bp, 1), jnp.float32),
        grid=(n_tiles,),
        in_specs=[
            pl.BlockSpec((TB, D), lambda i: (i, 0)),    # x tile (pipelined)
            pl.BlockSpec((D, Hp), lambda i: (0, 0)),    # w1 (resident)
            pl.BlockSpec((1, Hp), lambda i: (0, 0)),    # b1
            pl.BlockSpec((Hp, Hp), lambda i: (0, 0)),   # w2 (resident)
            pl.BlockSpec((1, Hp), lambda i: (0, 0)),    # b2
            pl.BlockSpec((1, Hp), lambda i: (0, 0)),    # w3 row
            pl.BlockSpec(memory_space=pltpu.MemorySpace.SMEM),  # b3 scalar
        ],
        out_specs=pl.BlockSpec((TB, 1), lambda i: (i, 0)),
        compiler_params=pltpu.CompilerParams(
            dimension_semantics=("parallel",),
            vmem_limit_bytes=vmem_limit),
        cost_estimate=pl.CostEstimate(flops=int(flops),
                                      transcendentals=0,
                                      bytes_accessed=int(bytes_accessed)),
    )(x, w1p, b1p, w2p, b2p, w3p, b3p)

    # Valid rows only; matches PyTorch .squeeze() for B > 1.
    return out[:B, 0]


def init_params(key, n_channels, image_size, h_dim):
    """Deterministic init mimicking nn.Linear default (uniform +/- 1/sqrt(fan_in))."""
    D = image_size * image_size * n_channels
    ks = jax.random.split(key, 6)

    def linear(kw, kb, fan_in, fan_out):
        bound = 1.0 / jnp.sqrt(jnp.float32(fan_in))
        w = jax.random.uniform(kw, (fan_in, fan_out), jnp.float32, -bound, bound)
        b = jax.random.uniform(kb, (fan_out,), jnp.float32, -bound, bound)
        return w, b

    w1, b1 = linear(ks[0], ks[1], D, h_dim)
    w2, b2 = linear(ks[2], ks[3], h_dim, h_dim)
    w3, b3 = linear(ks[4], ks[5], h_dim, 1)
    return (w1, b1, w2, b2, w3, b3)


if __name__ == "__main__":
    # Small shapes consistent with the module's forward.
    batch = 4
    n_channels = 3
    image_size = 16
    h_dim = 32

    key = jax.random.PRNGKey(0)
    k_x, k_p = jax.random.split(key)

    x = jax.random.normal(k_x, (batch, n_channels, image_size, image_size),
                          dtype=jnp.float32)
    params = init_params(k_p, n_channels, image_size, h_dim)
    w1, b1, w2, b2, w3, b3 = params
    xf = x.reshape(batch, -1)

    # ---- f32 compute path: strict check against a plain-JAX reference ----
    prepared_f32 = prepare_params(params, compute_dtype=jnp.float32)
    out_f32 = jax.block_until_ready(discriminator_forward(x, prepared_f32))

    ref = jnp.maximum(xf @ w1 + b1, 0.0)
    ref = jnp.maximum(ref @ w2 + b2, 0.0)
    ref = jnp.squeeze(ref @ w3 + b3, axis=-1)
    assert out_f32.shape == (batch,)
    assert jnp.allclose(out_f32, ref, atol=1e-5, rtol=1e-5), "f32 mismatch"

    # ---- default bf16-compute path (f32 accumulation): check vs bf16-cast ref ----
    prepared_bf16 = prepare_params(params)  # bf16 default
    out_bf16 = jax.block_until_ready(discriminator_forward(x, prepared_bf16))

    xb = xf.astype(jnp.bfloat16)
    rb = jnp.maximum(jnp.dot(xb, w1.astype(jnp.bfloat16),
                             preferred_element_type=jnp.float32) + b1, 0.0)
    rb = jnp.maximum(jnp.dot(rb.astype(jnp.bfloat16), w2.astype(jnp.bfloat16),
                             preferred_element_type=jnp.float32) + b2, 0.0)
    rb = jnp.squeeze(rb @ w3 + b3, axis=-1)
    assert out_bf16.shape == (batch,)
    assert jnp.allclose(out_bf16, rb, atol=2e-3, rtol=2e-3), "bf16 mismatch"

    print("KERNEL_OK")
</pallas_src>

<mosaic_0001>
module attributes {stable_mosaic.version = 11 : i64} {
  func.func @_disc_kernel(%arg0: i32, %arg1: memref<8x768xf32, #tpu.memory_space<vmem>>, %arg2: memref<768x128xf32, #tpu.memory_space<vmem>>, %arg3: memref<1x128xf32, #tpu.memory_space<vmem>>, %arg4: memref<128x128xf32, #tpu.memory_space<vmem>>, %arg5: memref<1x128xf32, #tpu.memory_space<vmem>>, %arg6: memref<1x128xf32, #tpu.memory_space<vmem>>, %arg7: memref<1xf32, #tpu.memory_space<smem>>, %arg8: memref<8x1xf32, #tpu.memory_space<vmem>>) attributes {dimension_semantics = [#tpu.dimension_semantics<parallel>], iteration_bounds = array<i64: 1>, scalar_prefetch = 0 : i64, scratch_operands = 0 : i64, tpu.core_type = #tpu.core_type<tc>, window_params = [{transform_indices = @transform_0, window_bounds = array<i64: 8, 768>}, {pipeline_mode = #tpu.pipeline_mode<synchronous>, transform_indices = @transform_1, window_bounds = array<i64: 768, 128>}, {pipeline_mode = #tpu.pipeline_mode<synchronous>, transform_indices = @transform_2, window_bounds = array<i64: 1, 128>}, {pipeline_mode = #tpu.pipeline_mode<synchronous>, transform_indices = @transform_3, window_bounds = array<i64: 128, 128>}, {pipeline_mode = #tpu.pipeline_mode<synchronous>, transform_indices = @transform_4, window_bounds = array<i64: 1, 128>}, {pipeline_mode = #tpu.pipeline_mode<synchronous>, transform_indices = @transform_5, window_bounds = array<i64: 1, 128>}, {transform_indices = @transform_6, window_bounds = array<i64: 1>}, {transform_indices = @transform_7, window_bounds = array<i64: 8, 1>}]} {
    %c0 = arith.constant 0 : index
    %c0_0 = arith.constant 0 : index
    %0 = vector.load %arg1[%c0, %c0_0] : memref<8x768xf32, #tpu.memory_space<vmem>>, vector<8x768xf32>
    %c0_1 = arith.constant 0 : index
    %c0_2 = arith.constant 0 : index
    %1 = vector.load %arg2[%c0_1, %c0_2] : memref<768x128xf32, #tpu.memory_space<vmem>>, vector<768x128xf32>
    %cst = arith.constant dense<0.000000e+00> : vector<8x128xf32>
    %2 = tpu.matmul %0, %1, %cst {dimension_numbers = #tpu.dot_dimension_numbers<[1], [0], [0], [1], [0, 0, 1, 1], [], []>} : vector<8x768xf32>, vector<768x128xf32>, vector<8x128xf32> -> vector<8x128xf32>
    %c0_3 = arith.constant 0 : index
    %c0_4 = arith.constant 0 : index
    %3 = vector.load %arg3[%c0_3, %c0_4] : memref<1x128xf32, #tpu.memory_space<vmem>>, vector<1x128xf32>
    %4 = vector.broadcast %3 : vector<1x128xf32> to vector<8x128xf32>
    %5 = arith.addf %2, %4 : vector<8x128xf32>
    %cst_5 = arith.constant 0.000000e+00 : f32
    %6 = vector.broadcast %cst_5 : f32 to vector<8x128xf32>
    %7 = arith.maximumf %5, %6 : vector<8x128xf32>
    %c0_6 = arith.constant 0 : index
    %c0_7 = arith.constant 0 : index
    %8 = vector.load %arg4[%c0_6, %c0_7] : memref<128x128xf32, #tpu.memory_space<vmem>>, vector<128x128xf32>
    %cst_8 = arith.constant dense<0.000000e+00> : vector<8x128xf32>
    %9 = tpu.matmul %7, %8, %cst_8 {dimension_numbers = #tpu.dot_dimension_numbers<[1], [0], [0], [1], [0, 0, 1, 1], [], []>} : vector<8x128xf32>, vector<128x128xf32>, vector<8x128xf32> -> vector<8x128xf32>
    %c0_9 = arith.constant 0 : index
    %c0_10 = arith.constant 0 : index
    %10 = vector.load %arg5[%c0_9, %c0_10] : memref<1x128xf32, #tpu.memory_space<vmem>>, vector<1x128xf32>
    %11 = vector.broadcast %10 : vector<1x128xf32> to vector<8x128xf32>
    %12 = arith.addf %9, %11 : vector<8x128xf32>
    %cst_11 = arith.constant 0.000000e+00 : f32
    %13 = vector.broadcast %cst_11 : f32 to vector<8x128xf32>
    %14 = arith.maximumf %12, %13 : vector<8x128xf32>
    %c0_12 = arith.constant 0 : index
    %c0_13 = arith.constant 0 : index
    %15 = vector.load %arg6[%c0_12, %c0_13] : memref<1x128xf32, #tpu.memory_space<vmem>>, vector<1x128xf32>
    %16 = vector.broadcast %15 : vector<1x128xf32> to vector<8x128xf32>
    %17 = arith.mulf %14, %16 : vector<8x128xf32>
    %cst_14 = arith.constant dense<0.000000e+00> : vector<8xf32>
    %18 = vector.multi_reduction <add>, %17, %cst_14 [1] : vector<8x128xf32> to vector<8xf32>
    %19 = vector.shape_cast %18 : vector<8xf32> to vector<8x1xf32>
    %c0_15 = arith.constant 0 : index
    %20 = memref.load %arg7[%c0_15] : memref<1xf32, #tpu.memory_space<smem>>
    %21 = vector.broadcast %20 : f32 to vector<8x1xf32>
    %22 = arith.addf %19, %21 : vector<8x1xf32>
    %c0_16 = arith.constant 0 : index
    %c0_17 = arith.constant 0 : index
    %23 = vector.load %arg8[%c0_16, %c0_17] : memref<8x1xf32, #tpu.memory_space<vmem>>, vector<8x1xf32>
    tpu.vector_store %arg8[%c0_16, %c0_17], %22 {strides = array<i32>} : memref<8x1xf32, #tpu.memory_space<vmem>>, vector<8x1xf32>,
    return
  }
  func.func @transform_0(%arg0: i32) -> (i32, i32) {
    %c0_i32 = arith.constant 0 : i32
    %c0_i32_0 = arith.constant 0 : i32
    return %arg0, %c0_i32 : i32, i32
  }
  func.func @transform_1(%arg0: i32) -> (i32, i32) {
    %c0_i32 = arith.constant 0 : i32
    %c0_i32_0 = arith.constant 0 : i32
    %c0_i32_1 = arith.constant 0 : i32
    return %c0_i32, %c0_i32_0 : i32, i32
  }
  func.func @transform_2(%arg0: i32) -> (i32, i32) {
    %c0_i32 = arith.constant 0 : i32
    %c0_i32_0 = arith.constant 0 : i32
    %c0_i32_1 = arith.constant 0 : i32
    return %c0_i32, %c0_i32_0 : i32, i32
  }
  func.func @transform_3(%arg0: i32) -> (i32, i32) {
    %c0_i32 = arith.constant 0 : i32
    %c0_i32_0 = arith.constant 0 : i32
    %c0_i32_1 = arith.constant 0 : i32
    return %c0_i32, %c0_i32_0 : i32, i32
  }
  func.func @transform_4(%arg0: i32) -> (i32, i32) {
    %c0_i32 = arith.constant 0 : i32
    %c0_i32_0 = arith.constant 0 : i32
    %c0_i32_1 = arith.constant 0 : i32
    return %c0_i32, %c0_i32_0 : i32, i32
  }
  func.func @transform_5(%arg0: i32) -> (i32, i32) {
    %c0_i32 = arith.constant 0 : i32
    %c0_i32_0 = arith.constant 0 : i32
    %c0_i32_1 = arith.constant 0 : i32
    return %c0_i32, %c0_i32_0 : i32, i32
  }
  func.func @transform_6(%arg0: i32) -> i32 {
    %c0_i32 = arith.constant 0 : i32
    %c0_i32_0 = arith.constant 0 : i32
    return %c0_i32 : i32
  }
  func.func @transform_7(%arg0: i32) -> (i32, i32) {
    %c0_i32 = arith.constant 0 : i32
    %c0_i32_0 = arith.constant 0 : i32
    return %arg0, %c0_i32 : i32, i32
  }
}

</mosaic_0001>

<bundles_post_ra>
// kernel: discriminator_forward.1
= control target key start
LH: loop header
LB: loop body
LE: loop exit
PB: predicated region body
PF: predicated region fallthrough
CT: control target
= control target key end

     0   :  { %13 = vsyncpa [#allocation4], 0  ;;  %s662_s24 = smov [#allocation3]   ;;  %s791_s0 = inlined_call_operand.vmem [shape: f32[8,768], index: 0, kind: input, shape index: {}]   ;;  %s792_s1 = inlined_call_operand.hbm [shape: f32[768,128], index: 1, kind: input, shape index: {}]   ;;  %s793_s2 = inlined_call_operand.vmem [shape: f32[1,128], index: 2, kind: input, shape index: {}]   ;;  %s794_s3 = inlined_call_operand.vmem [shape: f32[128,128], index: 3, kind: input, shape index: {}]   ;;  %s795_s4 = inlined_call_operand.vmem [shape: f32[1,128], index: 4, kind: input, shape index: {}]   ;;  %s796_s5 = inlined_call_operand.vmem [shape: f32[1,128], index: 5, kind: input, shape index: {}]   ;;  %s797_s6 = inlined_call_operand.<no memory space> [shape: f32[1], index: 6, kind: input, shape index: {}]   ;;  %s798_s7 = inlined_call_operand.vmem [shape: f32[8,1], index: 7, kind: output, shape index: {}]  }
   0x1   :  { %s21_s25 = sshll.u32 %s662_s24, 4  ;;  %s22_s25 = int_to_ptr.vmem [resolvable:$true] %s21_s25 }
   0x2   :  { %s648_s26 = scalar_lea.vmem %s22_s25, 12288  ;;  %p653_p1 = scmp.lt.s32.totalorder %s22_s25, %s22_s25 }
   0x3   :  { %p649_p0 = scmp.ne.s32.totalorder %s22_s25, %s648_s26  ;;  %p654_p2 = scmp.lt.s32.totalorder %s648_s26, %s648_s26 }
   0x5   :  { %p655_p3 = por %p654_p2, %p653_p1 }
   0x7   :  { %p656_p4 = pnand %p655_p3, %p649_p0 }
   0x9   :  { %659 = shalt.err (!%p656_p4)
}
   0xa   :  { %s663_s27 = smov 128   ;;  %s664_s28 = smov 8  }
   0xb   :  { %27 = dma.hbm_to_vmem [thread:$0]  %s792_s1, 12288, %s22_s25, [#allocation4], %s663_s27, %s663_s27, %s664_s28  }
   0xc   :  { %660 = dma.done.wait [#allocation4], 12288  }
   0xd   :  { %661 = vsyncadd [#allocation4], 4294955008  ;;  %v78_v0 = vld [vmem:[#allocation3 + $0xf8] sm:$0xff]  ;;  %v77_v2 = vld [vmem:[#allocation3 + $0xf0] sm:$0xff]  ;;  %vm666_vm0 = vmmov 0   ;;  %vm468_vm1 = vcmask 7168  }
   0xe   :  { %v62_v1 = vld [vmem:[#allocation3 + $0x78] sm:$0xff]  ;;  %478 = vmatprep.subr.mxu0 %v78_v0  ;;  %v61_v4 = vld [vmem:[#allocation3 + $0x70] sm:$0xff]  ;;  %v76_v6 = vld [vmem:[#allocation3 + $0xe8] sm:$0xff] }
   0xf   :  { %v110_v3 = vld [vmem:[#allocation3 + $0x1f8] sm:$0xff]  ;;  %479 = vmatpush3.msra.mxu0 %v62_v1  ;;  %v109_v7 = vld [vmem:[#allocation3 + $0x1f0] sm:$0xff]  ;;  %v60_v8 = vld [vmem:[#allocation3 + $0x68] sm:$0xff] }
  0x10   :  { %v94_v5 = vld [vmem:[#allocation3 + $0x178] sm:$0xff]  ;;  %513 = vmatprep.subr.mxu1 %v110_v3  ;;  %480 = vmatprep.subr.mxu0 %v77_v2  ;;  %v93_v9 = vld [vmem:[#allocation3 + $0x170] sm:$0xff]  ;;  %v108_v10 = vld [vmem:[#allocation3 + $0x1e8] sm:$0xff] }
  0x11   :  { %514 = vmatpush3.msra.mxu1 %v94_v5  ;;  %481 = vmatpush3.msra.mxu0 %v61_v4  ;;  %v75_v11 = vld [vmem:[#allocation3 + $0xe0] sm:$0xff]  ;;  %v92_v12 = vld [vmem:[#allocation3 + $0x168] sm:$0xff]  ;;  %v74_v15 = vld [vmem:[#allocation3 + $0xd8] sm:$0xff] }
  0x12   :  { %515 = vmatprep.subr.mxu1 %v109_v7  ;;  %482 = vmatprep.subr.mxu0 %v76_v6  ;;  %v59_v13 = vld [vmem:[#allocation3 + $0x60] sm:$0xff]  ;;  %v58_v17 = vld [vmem:[#allocation3 + $0x58] sm:$0xff]  ;;  %v73_v19 = vld [vmem:[#allocation3 + $0xd0] sm:$0xff] }
  0x13   :  { %516 = vmatpush3.msra.mxu1 %v93_v9  ;;  %v107_v14 = vld [vmem:[#allocation3 + $0x1e0] sm:$0xff]  ;;  %483 = vmatpush3.msra.mxu0 %v60_v8  ;;  %v106_v18 = vld [vmem:[#allocation3 + $0x1d8] sm:$0xff]  ;;  %v57_v21 = vld [vmem:[#allocation3 + $0x50] sm:$0xff] }
  0x14   :  { %517 = vmatprep.subr.mxu1 %v108_v10  ;;  %v91_v16 = vld [vmem:[#allocation3 + $0x160] sm:$0xff]  ;;  %484 = vmatprep.subr.mxu0 %v75_v11  ;;  %v90_v20 = vld [vmem:[#allocation3 + $0x158] sm:$0xff]  ;;  %v105_v22 = vld [vmem:[#allocation3 + $0x1d0] sm:$0xff] }
  0x15   :  { %518 = vmatpush3.msra.mxu1 %v92_v12  ;;  %485 = vmatpush3.msra.mxu0 %v59_v13  ;;  %v72_v23 = vld [vmem:[#allocation3 + $0xc8] sm:$0xff]  ;;  %v89_v24 = vld [vmem:[#allocation3 + $0x150] sm:$0xff]  ;;  %v71_v27 = vld [vmem:[#allocation3 + $0xc0] sm:$0xff] }
  0x16   :  { %519 = vmatprep.subr.mxu1 %v107_v14  ;;  %486 = vmatprep.subr.mxu0 %v74_v15  ;;  %v56_v25 = vld [vmem:[#allocation3 + $0x48] sm:$0xff]  ;;  %v55_v29 = vld [vmem:[#allocation3 + $0x40] sm:$0xff]  ;;  %v70_v31 = vld [vmem:[#allocation3 + $0xb8] sm:$0xff] }
  0x17   :  { %520 = vmatpush3.msra.mxu1 %v91_v16  ;;  %487 = vmatpush3.msra.mxu0 %v58_v17  ;;  %v104_v26 = vld [vmem:[#allocation3 + $0x1c8] sm:$0xff]  ;;  %v103_v30 = vld [vmem:[#allocation3 + $0x1c0] sm:$0xff]  ;;  %v54_v33 = vld [vmem:[#allocation3 + $0x38] sm:$0xff] }
  0x18   :  { %521 = vmatprep.subr.mxu1 %v106_v18  ;;  %488 = vmatprep.subr.mxu0 %v73_v19  ;;  %v88_v28 = vld [vmem:[#allocation3 + $0x148] sm:$0xff]  ;;  %v87_v32 = vld [vmem:[#allocation3 + $0x140] sm:$0xff]  ;;  %v102_v34 = vld [vmem:[#allocation3 + $0x1b8] sm:$0xff] }
  0x19   :  { %522 = vmatpush3.msra.mxu1 %v90_v20  ;;  %489 = vmatpush3.msra.mxu0 %v57_v21  ;;  %v69_v35 = vld [vmem:[#allocation3 + $0xb0] sm:$0xff]  ;;  %v86_v36 = vld [vmem:[#allocation3 + $0x138] sm:$0xff]  ;;  %v68_v39 = vld [vmem:[#allocation3 + $0xa8] sm:$0xff] }
  0x1a   :  { %523 = vmatprep.subr.mxu1 %v105_v22  ;;  %490 = vmatprep.subr.mxu0 %v72_v23  ;;  %v53_v37 = vld [vmem:[#allocation3 + $0x30] sm:$0xff]  ;;  %v52_v41 = vld [vmem:[#allocation3 + $0x28] sm:$0xff]  ;;  %v67_v43 = vld [vmem:[#allocation3 + $0xa0] sm:$0xff] }
  0x1b   :  { %524 = vmatpush3.msra.mxu1 %v89_v24  ;;  %491 = vmatpush3.msra.mxu0 %v56_v25  ;;  %v101_v38 = vld [vmem:[#allocation3 + $0x1b0] sm:$0xff]  ;;  %v100_v42 = vld [vmem:[#allocation3 + $0x1a8] sm:$0xff]  ;;  %v51_v45 = vld [vmem:[#allocation3 + $0x20] sm:$0xff] }
  0x1c   :  { %525 = vmatprep.subr.mxu1 %v104_v26  ;;  %492 = vmatprep.subr.mxu0 %v71_v27  ;;  %v85_v40 = vld [vmem:[#allocation3 + $0x130] sm:$0xff]  ;;  %v84_v44 = vld [vmem:[#allocation3 + $0x128] sm:$0xff]  ;;  %v99_v46 = vld [vmem:[#allocation3 + $0x1a0] sm:$0xff] }
  0x1d   :  { %526 = vmatpush3.msra.mxu1 %v88_v28  ;;  %493 = vmatpush3.msra.mxu0 %v55_v29  ;;  %v66_v47 = vld [vmem:[#allocation3 + $0x98] sm:$0xff]  ;;  %v83_v48 = vld [vmem:[#allocation3 + $0x120] sm:$0xff]  ;;  %v65_v51 = vld [vmem:[#allocation3 + $0x90] sm:$0xff] }
  0x1e   :  { %527 = vmatprep.subr.mxu1 %v103_v30  ;;  %494 = vmatprep.subr.mxu0 %v70_v31  ;;  %v50_v49 = vld [vmem:[#allocation3 + $0x18] sm:$0xff]  ;;  %v49_v53 = vld [vmem:[#allocation3 + $0x10] sm:$0xff]  ;;  %v64_v55 = vld [vmem:[#allocation3 + $0x88] sm:$0xff] }
  0x1f   :  { %528 = vmatpush3.msra.mxu1 %v87_v32  ;;  %495 = vmatpush3.msra.mxu0 %v54_v33  ;;  %v98_v50 = vld [vmem:[#allocation3 + $0x198] sm:$0xff]  ;;  %v97_v54 = vld [vmem:[#allocation3 + $0x190] sm:$0xff]  ;;  %v48_v57 = vld [vmem:[#allocation3 + $0x8] sm:$0xff] }
  0x20   :  { %529 = vmatprep.subr.mxu1 %v102_v34  ;;  %496 = vmatprep.subr.mxu0 %v69_v35  ;;  %v82_v52 = vld [vmem:[#allocation3 + $0x118] sm:$0xff]  ;;  %v81_v56 = vld [vmem:[#allocation3 + $0x110] sm:$0xff]  ;;  %v96_v58 = vld [vmem:[#allocation3 + $0x188] sm:$0xff] }
  0x21   :  { %530 = vmatpush3.msra.mxu1 %v86_v36  ;;  %497 = vmatpush3.msra.mxu0 %v53_v37  ;;  %v63_v59 = vld [vmem:[#allocation3 + $0x80] sm:$0xff]  ;;  %v42_v60 = vld [vmem:[%s791_s0 + $0x8] sm:$0xff]  ;;  %v142_v1 = vld [vmem:[#allocation3 + $0x2f8] sm:$0xff] }
  0x22   :  { %531 = vmatprep.subr.mxu1 %v101_v38  ;;  %498 = vmatprep.subr.mxu0 %v68_v39  ;;  %v47_v61 = vld [vmem:[#allocation3] sm:$0xff]  ;;  %v80_v62 = vld [vmem:[#allocation3 + $0x108] sm:$0xff]  ;;  %v44_v3 = vld [vmem:[%s791_s0 + $0x18] sm:$0xff]  ;;  %v665_v39 = vmov 0.0  }
  0x23   :  { %532 = vmatpush3.msra.mxu1 %v85_v40  ;;  %499 = vmatpush3.msra.mxu0 %v52_v41  ;;  %v41_v63 = vld [vmem:[%s791_s0] sm:$0xff]  ;;  %v126_v4 = vld [vmem:[#allocation3 + $0x278] sm:$0xff]  ;;  %v43_v5 = vld [vmem:[%s791_s0 + $0x10] sm:$0xff] }
  0x24   :  { %533 = vmatprep.subr.mxu1 %v100_v42  ;;  %500 = vmatprep.subr.mxu0 %v67_v43  ;;  %v95_v0 = vld [vmem:[#allocation3 + $0x180] sm:$0xff]  ;;  %v141_v6 = vld [vmem:[#allocation3 + $0x2f0] sm:$0xff]  ;;  %v46_v8 = vld [vmem:[%s791_s0 + $0x28] sm:$0xff] }
  0x25   :  { %534 = vmatpush3.msra.mxu1 %v84_v44  ;;  %501 = vmatpush3.msra.mxu0 %v51_v45  ;;  %v79_v2 = vld [vmem:[#allocation3 + $0x100] sm:$0xff]  ;;  %v125_v7 = vld [vmem:[#allocation3 + $0x270] sm:$0xff]  ;;  %v140_v9 = vld [vmem:[#allocation3 + $0x2e8] sm:$0xff] }
  0x26   :  { %535 = vmatprep.subr.mxu1 %v99_v46  ;;  %502 = vmatprep.subr.mxu0 %v66_v47  ;;  %v124_v10 = vld [vmem:[#allocation3 + $0x268] sm:$0xff]  ;;  %v139_v11 = vld [vmem:[#allocation3 + $0x2e0] sm:$0xff]  ;;  %v138_v13 = vld [vmem:[#allocation3 + $0x2d8] sm:$0xff] }
  0x27   :  { %536 = vmatpush3.msra.mxu1 %v83_v48  ;;  %503 = vmatpush3.msra.mxu0 %v50_v49  ;;  %v123_v12 = vld [vmem:[#allocation3 + $0x260] sm:$0xff]  ;;  %v122_v14 = vld [vmem:[#allocation3 + $0x258] sm:$0xff]  ;;  %v137_v15 = vld [vmem:[#allocation3 + $0x2d0] sm:$0xff] }
  0x28   :  { %537 = vmatprep.subr.mxu1 %v98_v50  ;;  %504 = vmatprep.subr.mxu0 %v65_v51  ;;  %v121_v16 = vld [vmem:[#allocation3 + $0x250] sm:$0xff]  ;;  %v136_v17 = vld [vmem:[#allocation3 + $0x2c8] sm:$0xff]  ;;  %v135_v19 = vld [vmem:[#allocation3 + $0x2c0] sm:$0xff] }
  0x29   :  { %538 = vmatpush3.msra.mxu1 %v82_v52  ;;  %505 = vmatpush3.msra.mxu0 %v49_v53  ;;  %v120_v18 = vld [vmem:[#allocation3 + $0x248] sm:$0xff]  ;;  %v119_v20 = vld [vmem:[#allocation3 + $0x240] sm:$0xff]  ;;  %v134_v21 = vld [vmem:[#allocation3 + $0x2b8] sm:$0xff] }
  0x2a   :  { %539 = vmatprep.subr.mxu1 %v97_v54  ;;  %506 = vmatprep.subr.mxu0 %v64_v55  ;;  %v118_v22 = vld [vmem:[#allocation3 + $0x238] sm:$0xff]  ;;  %v133_v23 = vld [vmem:[#allocation3 + $0x2b0] sm:$0xff]  ;;  %v132_v25 = vld [vmem:[#allocation3 + $0x2a8] sm:$0xff] }
  0x2b   :  { %540 = vmatpush3.msra.mxu1 %v81_v56  ;;  %507 = vmatpush3.msra.mxu0 %v48_v57  ;;  %v117_v24 = vld [vmem:[#allocation3 + $0x230] sm:$0xff]  ;;  %v116_v26 = vld [vmem:[#allocation3 + $0x228] sm:$0xff]  ;;  %v131_v27 = vld [vmem:[#allocation3 + $0x2a0] sm:$0xff] }
  0x2c   :  { %541 = vmatprep.subr.mxu1 %v96_v58  ;;  %508 = vmatprep.subr.mxu0 %v63_v59  ;;  %v115_v28 = vld [vmem:[#allocation3 + $0x220] sm:$0xff]  ;;  %v130_v29 = vld [vmem:[#allocation3 + $0x298] sm:$0xff]  ;;  %v129_v31 = vld [vmem:[#allocation3 + $0x290] sm:$0xff] }
  0x2d   :  { %214 = vmatprep.mubr.f32.mxu0 %v42_v60  ;;  %509 = vmatpush3.msra.mxu0 %v47_v61  ;;  %v114_v30 = vld [vmem:[#allocation3 + $0x218] sm:$0xff]  ;;  %v113_v32 = vld [vmem:[#allocation3 + $0x210] sm:$0xff]  ;;  %v128_v33 = vld [vmem:[#allocation3 + $0x288] sm:$0xff] }
  0x2e   :  { %542 = vmatpush3.msra.mxu1 %v80_v62  ;;  %215 = vmatmul.mubr.f32.vlgmr.msra.gmra.mxu0 %v41_v63  ;;  %v112_v34 = vld [vmem:[#allocation3 + $0x208] sm:$0xff]  ;;  %v127_v35 = vld [vmem:[#allocation3 + $0x280] sm:$0xff]  ;;  %v376_v38 = vld [vmem:[%s794_s3 + $0x78] sm:$0xff] }
  0x2f   :  { %543 = vmatprep.subr.mxu1 %v95_v0  ;;  %548 = vmatprep.subr.mxu0 %v142_v1  ;;  %v111_v36 = vld [vmem:[#allocation3 + $0x200] sm:$0xff]  ;;  %v375_v40 = vld [vmem:[%s794_s3 + $0x70] sm:$0xff]  ;;  %v374_v41 = vld [vmem:[%s794_s3 + $0x68] sm:$0xff] }
  0x30   :  { %544 = vmatpush3.msra.mxu1 %v79_v2  ;;  %284 = vmatprep.mubr.f32.mxu1 %v44_v3  ;;  %v45_v37 = vld [vmem:[%s791_s0 + $0x20] sm:$0xff]  ;;  %v372_v43 = vld [vmem:[%s794_s3 + $0x58] sm:$0xff]  ;;  %v371_v44 = vld [vmem:[%s794_s3 + $0x50] sm:$0xff] }
  0x31   :  { %549 = vmatpush3.msra.mxu0 %v126_v4  ;;  %285 = vmatmul.mubr.f32.vlgmr.msra.gmra.mxu1 %v43_v5  ;;  %v373_v42 = vld [vmem:[%s794_s3 + $0x60] sm:$0xff]  ;;  %v370_v45 = vld [vmem:[%s794_s3 + $0x48] sm:$0xff]  ;;  %v368_v47 = vld [vmem:[%s794_s3 + $0x38] sm:$0xff] }
  0x32   :  { %550 = vmatprep.subr.mxu0 %v141_v6  ;;  %354 = vmatprep.mubr.f32.mxu0 %v46_v8  ;;  %v369_v46 = vld [vmem:[%s794_s3 + $0x40] sm:$0xff]  ;;  %v367_v48 = vld [vmem:[%s794_s3 + $0x30] sm:$0xff]  ;;  %v366_v49 = vld [vmem:[%s794_s3 + $0x28] sm:$0xff] }
  0x33   :  { %551 = vmatpush3.msra.mxu0 %v125_v7  ;;  %600 = vmatprep.subr.mxu1 %v665_v39  ;;  %v365_v50 = vld [vmem:[%s794_s3 + $0x20] sm:$0xff]  ;;  %v364_v51 = vld [vmem:[%s794_s3 + $0x18] sm:$0xff]  ;;  %v363_v52 = vld [vmem:[%s794_s3 + $0x10] sm:$0xff] }
  0x34   :  { %552 = vmatprep.subr.mxu0 %v140_v9  ;;  %601 = vmatpush3.msra.mxu1 %v376_v38  ;;  %v362_v53 = vld [vmem:[%s794_s3 + $0x8] sm:$0xff]  ;;  %v361_v54 = vld [vmem:[%s794_s3] sm:$0xff] }
  0x35   :  { %553 = vmatpush3.msra.mxu0 %v124_v10  ;;  %602 = vmatprep.subr.mxu1 %v665_v39  ;;  %v475_v59 = vld [vmem:[%s793_s2] ss:$0 sm:$0xff] }
  0x36   :  { %554 = vmatprep.subr.mxu0 %v139_v11  ;;  %603 = vmatpush3.msra.mxu1 %v375_v40  ;;  %v476_v5 = vld [vmem:[%s795_s4] ss:$0 sm:$0xff] }
  0x37   :  { %555 = vmatpush3.msra.mxu0 %v123_v12  ;;  %604 = vmatprep.subr.mxu1 %v665_v39  ;;  %v477_v9 = vld [vmem:[%s796_s5] ss:$0 sm:$0xff]  ;;  %v466_v12 = vstv %s797_s6 }
  0x38   :  { %556 = vmatprep.subr.mxu0 %v138_v13  ;;  %605 = vmatpush3.msra.mxu1 %v374_v41 }
  0x39   :  { %557 = vmatpush3.msra.mxu0 %v122_v14  ;;  %606 = vmatprep.subr.mxu1 %v665_v39 }
  0x3a   :  { %558 = vmatprep.subr.mxu0 %v137_v15  ;;  %607 = vmatpush3.msra.mxu1 %v373_v42 }
  0x3b   :  { %559 = vmatpush3.msra.mxu0 %v121_v16  ;;  %608 = vmatprep.subr.mxu1 %v665_v39 }
  0x3c   :  { %560 = vmatprep.subr.mxu0 %v136_v17  ;;  %609 = vmatpush3.msra.mxu1 %v372_v43 }
  0x3d   :  { %561 = vmatpush3.msra.mxu0 %v120_v18  ;;  %610 = vmatprep.subr.mxu1 %v665_v39 }
  0x3e   :  { %562 = vmatprep.subr.mxu0 %v135_v19  ;;  %611 = vmatpush3.msra.mxu1 %v371_v44 }
  0x3f   :  { %563 = vmatpush3.msra.mxu0 %v119_v20  ;;  %612 = vmatprep.subr.mxu1 %v665_v39 }
  0x40   :  { %564 = vmatprep.subr.mxu0 %v134_v21  ;;  %613 = vmatpush3.msra.mxu1 %v370_v45 }
  0x41   :  { %565 = vmatpush3.msra.mxu0 %v118_v22  ;;  %614 = vmatprep.subr.mxu1 %v665_v39 }
  0x42   :  { %566 = vmatprep.subr.mxu0 %v133_v23  ;;  %615 = vmatpush3.msra.mxu1 %v369_v46 }
  0x43   :  { %567 = vmatpush3.msra.mxu0 %v117_v24  ;;  %616 = vmatprep.subr.mxu1 %v665_v39 }
  0x44   :  { %568 = vmatprep.subr.mxu0 %v132_v25  ;;  %617 = vmatpush3.msra.mxu1 %v368_v47 }
  0x45   :  { %569 = vmatpush3.msra.mxu0 %v116_v26  ;;  %618 = vmatprep.subr.mxu1 %v665_v39 }
  0x46   :  { %570 = vmatprep.subr.mxu0 %v131_v27  ;;  %619 = vmatpush3.msra.mxu1 %v367_v48 }
  0x47   :  { %571 = vmatpush3.msra.mxu0 %v115_v28  ;;  %620 = vmatprep.subr.mxu1 %v665_v39 }
  0x48   :  { %572 = vmatprep.subr.mxu0 %v130_v29  ;;  %621 = vmatpush3.msra.mxu1 %v366_v49 }
  0x49   :  { %573 = vmatpush3.msra.mxu0 %v114_v30  ;;  %622 = vmatprep.subr.mxu1 %v665_v39 }
  0x4a   :  { %574 = vmatprep.subr.mxu0 %v129_v31  ;;  %623 = vmatpush3.msra.mxu1 %v365_v50 }
  0x4b   :  { %575 = vmatpush3.msra.mxu0 %v113_v32  ;;  %624 = vmatprep.subr.mxu1 %v665_v39 }
  0x4c   :  { %576 = vmatprep.subr.mxu0 %v128_v33  ;;  %625 = vmatpush3.msra.mxu1 %v364_v51 }
  0x4d   :  { %577 = vmatpush3.msra.mxu0 %v112_v34  ;;  %626 = vmatprep.subr.mxu1 %v665_v39 }
  0x4e   :  { %578 = vmatprep.subr.mxu0 %v127_v35  ;;  %627 = vmatpush3.msra.mxu1 %v363_v52 }
  0x4f   :  { %579 = vmatpush3.msra.mxu0 %v111_v36  ;;  %628 = vmatprep.subr.mxu1 %v665_v39 }
  0x50   :  { %355 = vmatmul.mubr.f32.vlgmr.msra.gmra.mxu0 %v45_v37  ;;  %629 = vmatpush3.msra.mxu1 %v362_v53 }
  0x51   :  { %630 = vmatprep.subr.mxu1 %v665_v39  ;;  %632 = vmatprep.mubr.msk.f32.mxu1 %vm666_vm0, %v665_v39 }
  0x52   :  { %631 = vmatpush3.msra.mxu1 %v361_v54 }
  0xee   :  { %v510_v55 = vpop.f32.mrf.mxu0 }
  0xf0   :  { %v511_v56 = vpop.f32.mrf.mxu0 }
  0xf1   :  { %v545_v57 = vpop.f32.mrf.mxu1  ;;  %v512_v58 = vadd.f32 %v511_v56, %v510_v55 }
  0xf3   :  { %v546_v60 = vpop.f32.mrf.mxu1  ;;  %v217_v61 = vadd.f32 %v512_v58, %v475_v59 }
  0xf4   :  { %v547_v62 = vadd.f32 %v546_v60, %v545_v57 }
  0xf6   :  { %v287_v1 = vadd.f32 %v547_v62, %v217_v61 }
 0x110   :  { %v580_v63 = vpop.f32.mrf.mxu0 }
 0x112   :  { %v581_v0 = vpop.f32.mrf.mxu0 }
 0x113   :  { %v582_v2 = vadd.f32 %v581_v0, %v580_v63 }
 0x115   :  { %v357_v3 = vadd.f32 %v582_v2, %v287_v1 }
 0x117   :  { %v360_v4 = vmax.f32 %v357_v3, 0.0 }
 0x119   :  { %633 = vmatmul.mubr.f32.vlgmr.msra.gmra.mxu1 %v360_v4 }
 0x1d9   :  { %v450_v6 = vpop.f32.mrf.mxu1 }
 0x1da   :  { %v451_v7 = vadd.f32 %v476_v5, %v450_v6 }
 0x1db   :  { %v634_v8 = vpop.f32.mrf.mxu1 }
 0x1dc   :  { %v454_v10 = vmax.f32 %v451_v7, 0.0 }
 0x1de   :  { %v462_v11 = vmul.f32 %v477_v9, %v454_v10 }
 0x1e0   :  { %463 = vadd.xlane.f32.xlu0 %v462_v11 }
 0x269   :  { %v464_v13 = vpop.xlane.xlu0 %463 }
 0x26a   :  { %v467_v14 = vadd.f32 %v466_v12, %v464_v13 }
 0x26c   :  { %469 = vst.msk [vmem:[%s798_s7] sm:$0xff] %vm468_vm1, %v467_v14 }
 0x26d   :  { %474 = vsyncpa [#allocation4], 1 }

</bundles_post_ra>
